<compile_context>
chip_gen: v6e
topology: v6e:2x2x1
jax: 0.10.0
libtpu: 0.0.40
codegen_flags: <defaults>
</compile_context>

<pallas_src>
import functools
import math

import numpy as np
import jax
import jax.numpy as jnp
from jax.experimental import pallas as pl
from jax.experimental.pallas import tpu as pltpu


# ---------------------------------------------------------------------------
# In-kernel math helpers
# ---------------------------------------------------------------------------
def _gelu_tanh(x):
    # tanh-form GELU: the transcendental goes to the EUP (separate VLIW slot),
    # leaving only ~7 VALU ops per element.  |err| vs exact erf-GELU ~1e-3.
    c = math.sqrt(2.0 / math.pi)
    return 0.5 * x * (1.0 + jnp.tanh(c * (x + 0.044715 * x * x * x)))


# ---------------------------------------------------------------------------
# Single fused kernel: embedding matmul + n_layers PastDecomposableMixing + GELU.
# Whole (merged) batch handled in one grid step; rows = B * n_steps.
# ---------------------------------------------------------------------------
def backbone_kernel(x_ref, dec_ref, we_ref, w1_ref, b1_ref, w2_ref, b2_ref,
                    g_ref, *, n_layers, n_rows):
    f32 = jnp.float32
    bf16 = jnp.bfloat16
    R = n_rows                                   # B * T rows

    # TokenEmbedding (circular Conv1d k=3) as ONE matmul: x was rolled/concatenated
    # to (R, 3C) on the host and the conv taps are stacked into we_ref (3C, D).
    h = jnp.dot(x_ref[...], we_ref[...], preferred_element_type=f32)     # (R, D) f32

    # dec = [I - AVG_blockdiag ; AVG_blockdiag]  (block-diagonal over batch, f32):
    # one matmul yields the stacked [season; trend] rows of the series decomposition.
    dec = dec_ref[...]                                                   # (2R, R) f32

    for layer in range(n_layers):                 # static unroll, L = 3
        z = jnp.dot(dec, h, preferred_element_type=f32)                  # (2R, D) f32
        a = (jnp.dot(z.astype(bf16), w1_ref[layer], preferred_element_type=f32)
             + b1_ref[layer])                                            # (2R, F) f32
        a = _gelu_tanh(a).astype(bf16)
        y = (jnp.dot(a, w2_ref[layer], preferred_element_type=f32)
             + b2_ref[layer])                                            # (2R, D) f32
        # single scale => multi-scale season/trend mixing is identity pass-through
        h = y[0:R, :] + y[R:2 * R, :]                                    # (R, D)

    g_ref[...] = _gelu_tanh(h)                                           # (R, D) f32


# ---------------------------------------------------------------------------
# Host-side operator construction
# ---------------------------------------------------------------------------
def build_decomp_operator(B, T, kernel_size):
    """AVG @ x reproduces AvgPool1d(kernel, stride=1) with replicate padding.
    Returns dec = [[I - AVG_bd], [AVG_bd]] (block-diagonal over batch, (2BT, BT))
    and the per-batch (T, T) avg matrix for the pure-JAX reference."""
    assert kernel_size % 2 == 1, "replicate-pad split assumes odd moving_avg kernel"
    half = (kernel_size - 1) // 2
    avg = np.zeros((T, T), dtype=np.float32)
    for t in range(T):
        for j in range(t - half, t - half + kernel_size):
            s = min(max(j, 0), T - 1)
            avg[t, s] += 1.0 / kernel_size
    avg_bd = np.kron(np.eye(B, dtype=np.float32), avg)                  # (BT, BT)
    dec = np.concatenate(
        [np.eye(B * T, dtype=np.float32) - avg_bd, avg_bd], axis=0)     # (2BT, BT)
    return dec.astype(np.float32), avg


def prepare_kernel_params(params, dec_op, T, D):
    """Pack f32 module params into the kernel layout (MXU weights bf16, biases and
    the decomposition operator f32; head weights stay f32 for the XLA GEMM)."""
    bf = jnp.bfloat16
    C = params["w_emb"].shape[1]
    return {
        "dec_op": jnp.asarray(dec_op, jnp.float32),                     # (2BT, BT) f32
        "w_emb_cat": params["w_emb"].reshape(3 * C, D).astype(bf),      # (3C, D) bf16
        "w1": params["w1"].astype(bf),                                  # (L, D, F) bf16
        "b1": params["b1"],                                             # (L, 1, F) f32
        "w2": params["w2"].astype(bf),                                  # (L, F, D) bf16
        "b2": params["b2"],                                             # (L, 1, D) f32
        "w_proj": params["w_proj"],                                     # (T*D, K) f32
        "b_proj": params["b_proj"],                                     # (1, K)  f32
    }


# ---------------------------------------------------------------------------
# Wrapper (single pallas_call + hoisted head GEMM, all under one jit)
# ---------------------------------------------------------------------------
def timemixer_forward(x, kp):
    B, T, C = x.shape
    L, D, Fh = kp["w1"].shape
    K = kp["b_proj"].shape[-1]
    R = B * T

    # Circular conv taps materialized host-side (XLA): rolls on a 512-byte array are
    # free; the kernel then needs a single embedding matmul.
    x_prev = jnp.roll(x, 1, axis=1)
    x_next = jnp.roll(x, -1, axis=1)
    x_cat = jnp.concatenate([x_prev, x, x_next], axis=-1)               # (B, T, 3C)
    x_cat = x_cat.reshape(R, 3 * C).astype(jnp.bfloat16)

    g = pl.pallas_call(
        functools.partial(backbone_kernel, n_layers=L, n_rows=R),
        out_shape=jax.ShapeDtypeStruct((R, D), jnp.float32),
        grid_spec=pltpu.PrefetchScalarGridSpec(
            num_scalar_prefetch=0,
            grid=(1,),                                  # merged batch: one step
            in_specs=[
                pl.BlockSpec((R, 3 * C), lambda i: (0, 0)),    # rolled/stacked x
                pl.BlockSpec((2 * R, R), lambda i: (0, 0)),    # decomposition operator
                pl.BlockSpec((3 * C, D), lambda i: (0, 0)),    # stacked conv taps
                pl.BlockSpec((L, D, Fh), lambda i: (0, 0, 0)),
                pl.BlockSpec((L, 1, Fh), lambda i: (0, 0, 0)),
                pl.BlockSpec((L, Fh, D), lambda i: (0, 0, 0)),
                pl.BlockSpec((L, 1, D), lambda i: (0, 0, 0)),
            ],
            out_specs=pl.BlockSpec((R, D), lambda i: (0, 0)),
        ),
    )(x_cat, kp["dec_op"], kp["w_emb_cat"], kp["w1"], kp["b1"], kp["w2"], kp["b2"])

    # Classification head hoisted to a single (B, T*D) @ (T*D, K) GEMM (per review):
    # replaces 16 M=1 in-kernel matmuls + a serial add chain with one MXU op.
    out = g.reshape(B, T * D) @ kp["w_proj"] + kp["b_proj"]
    return out


# ---------------------------------------------------------------------------
# Pure-JAX f32 reference (true module semantics) for the correctness check
# ---------------------------------------------------------------------------
def reference_forward(x, params, avg_mat, *, n_layers):
    gelu = lambda v: jax.nn.gelu(v, approximate=False)
    x_prev = jnp.roll(x, 1, axis=1)
    x_next = jnp.roll(x, -1, axis=1)
    h = (jnp.einsum("btc,cd->btd", x_prev, params["w_emb"][0])
         + jnp.einsum("btc,cd->btd", x, params["w_emb"][1])
         + jnp.einsum("btc,cd->btd", x_next, params["w_emb"][2]))
    for layer in range(n_layers):
        trend = jnp.einsum("ts,bsd->btd", avg_mat, h)
        season = h - trend

        def cross(z, l=layer):
            a = gelu(jnp.einsum("btd,df->btf", z, params["w1"][l]) + params["b1"][l])
            return jnp.einsum("btf,fd->btd", a, params["w2"][l]) + params["b2"][l]

        h = cross(season) + cross(trend)
    g = gelu(h).reshape(x.shape[0], -1)
    return g @ params["w_proj"] + params["b_proj"]


# ---------------------------------------------------------------------------
# Main
# ---------------------------------------------------------------------------
if __name__ == "__main__":
    # Module hyper-parameters (small but consistent with the PyTorch __init__).
    B = 2            # batch
    T = 16           # n_steps
    C = 4            # n_features
    D = 32           # d_model
    FF = 64          # d_ffn
    K = 5            # n_classes
    L = 3            # n_layers
    MOVING_AVG = 25  # moving_avg kernel size (default)

    key = jax.random.PRNGKey(0)
    ks = jax.random.split(key, 8)
    params = {
        # TokenEmbedding Conv1d weight [D, C, 3] stored as taps [3, C, D]
        # (w_emb[k][c, d] == torch_weight[d, c, k]); tap k=0 pairs with x[t-1].
        "w_emb": jax.random.normal(ks[0], (3, C, D), jnp.float32) / math.sqrt(3 * C),
        # per-layer cross_layer: Linear(D,F) / Linear(F,D) (weights stored transposed)
        "w1": jax.random.normal(ks[1], (L, D, FF), jnp.float32) / math.sqrt(D),
        "b1": 0.02 * jax.random.normal(ks[2], (L, 1, FF), jnp.float32),
        "w2": jax.random.normal(ks[3], (L, FF, D), jnp.float32) / math.sqrt(FF),
        "b2": 0.02 * jax.random.normal(ks[4], (L, 1, D), jnp.float32),
        # projection: Linear(T*D, K) weight [K, T*D] stored transposed as [T*D, K]
        "w_proj": jax.random.normal(ks[5], (T * D, K), jnp.float32) / math.sqrt(T * D),
        "b_proj": 0.02 * jax.random.normal(ks[6], (1, K), jnp.float32),
    }
    x = jax.random.normal(ks[7], (B, T, C), jnp.float32)

    dec_op, avg = build_decomp_operator(B, T, MOVING_AVG)
    kparams = prepare_kernel_params(params, dec_op, T, D)

    fwd = jax.jit(timemixer_forward)
    out = jax.block_until_ready(fwd(x, kparams))

    ref = reference_forward(x, params, jnp.asarray(avg), n_layers=L)
    # bf16 MXU operands (f32 accumulation) + tanh-GELU (~1e-3 vs exact erf) -> small
    # relative error vs the f32 exact-GELU reference.
    np.testing.assert_allclose(np.asarray(out), np.asarray(ref), rtol=3e-2, atol=3e-2)

    # TODO(synk): RevIN normalize_layers / preprocess are unused in the classification
    # forward path and dropout is identity at eval, so they are intentionally omitted.
    print("KERNEL_OK")
</pallas_src>

<mosaic_0001>
module attributes {stable_mosaic.version = 11 : i64} {
  func.func @backbone_kernel(%arg0: i32, %arg1: memref<32x12xbf16, #tpu.memory_space<vmem>>, %arg2: memref<64x32xf32, #tpu.memory_space<vmem>>, %arg3: memref<12x32xbf16, #tpu.memory_space<vmem>>, %arg4: memref<3x32x64xbf16, #tpu.memory_space<vmem>>, %arg5: memref<3x1x64xf32, #tpu.memory_space<vmem>>, %arg6: memref<3x64x32xbf16, #tpu.memory_space<vmem>>, %arg7: memref<3x1x32xf32, #tpu.memory_space<vmem>>, %arg8: memref<32x32xf32, #tpu.memory_space<vmem>>) attributes {dimension_semantics = [#tpu.dimension_semantics<arbitrary>], iteration_bounds = array<i64: 1>, scalar_prefetch = 0 : i64, scratch_operands = 0 : i64, tpu.core_type = #tpu.core_type<tc>, window_params = [{pipeline_mode = #tpu.pipeline_mode<synchronous>, transform_indices = @transform_0, window_bounds = array<i64: 32, 12>}, {pipeline_mode = #tpu.pipeline_mode<synchronous>, transform_indices = @transform_1, window_bounds = array<i64: 64, 32>}, {pipeline_mode = #tpu.pipeline_mode<synchronous>, transform_indices = @transform_2, window_bounds = array<i64: 12, 32>}, {pipeline_mode = #tpu.pipeline_mode<synchronous>, transform_indices = @transform_3, window_bounds = array<i64: 3, 32, 64>}, {pipeline_mode = #tpu.pipeline_mode<synchronous>, transform_indices = @transform_4, window_bounds = array<i64: 3, 1, 64>}, {pipeline_mode = #tpu.pipeline_mode<synchronous>, transform_indices = @transform_5, window_bounds = array<i64: 3, 64, 32>}, {pipeline_mode = #tpu.pipeline_mode<synchronous>, transform_indices = @transform_6, window_bounds = array<i64: 3, 1, 32>}, {pipeline_mode = #tpu.pipeline_mode<synchronous>, transform_indices = @transform_7, window_bounds = array<i64: 32, 32>}]} {
    %c0 = arith.constant 0 : index
    %c0_0 = arith.constant 0 : index
    %0 = vector.load %arg1[%c0, %c0_0] : memref<32x12xbf16, #tpu.memory_space<vmem>>, vector<32x12xbf16>
    %c0_1 = arith.constant 0 : index
    %c0_2 = arith.constant 0 : index
    %1 = vector.load %arg3[%c0_1, %c0_2] : memref<12x32xbf16, #tpu.memory_space<vmem>>, vector<12x32xbf16>
    %cst = arith.constant dense<0.000000e+00> : vector<32x32xf32>
    %2 = tpu.matmul %0, %1, %cst {dimension_numbers = #tpu.dot_dimension_numbers<[1], [0], [0], [1], [0, 0, 1, 1], [], []>} : vector<32x12xbf16>, vector<12x32xbf16>, vector<32x32xf32> -> vector<32x32xf32>
    %c0_3 = arith.constant 0 : index
    %c0_4 = arith.constant 0 : index
    %3 = vector.load %arg2[%c0_3, %c0_4] : memref<64x32xf32, #tpu.memory_space<vmem>>, vector<64x32xf32>
    %cst_5 = arith.constant dense<0.000000e+00> : vector<64x32xf32>
    %4 = tpu.matmul %3, %2, %cst_5 {dimension_numbers = #tpu.dot_dimension_numbers<[1], [0], [0], [1], [0, 0, 1, 1], [], []>} : vector<64x32xf32>, vector<32x32xf32>, vector<64x32xf32> -> vector<64x32xf32>
    %5 = arith.truncf %4 : vector<64x32xf32> to vector<64x32xbf16>
    %c0_6 = arith.constant 0 : index
    %c0_7 = arith.constant 0 : index
    %c0_8 = arith.constant 0 : index
    %6 = vector.load %arg4[%c0_6, %c0_7, %c0_8] : memref<3x32x64xbf16, #tpu.memory_space<vmem>>, vector<1x32x64xbf16>
    %7 = vector.shape_cast %6 : vector<1x32x64xbf16> to vector<32x64xbf16>
    %cst_9 = arith.constant dense<0.000000e+00> : vector<64x64xf32>
    %8 = tpu.matmul %5, %7, %cst_9 {dimension_numbers = #tpu.dot_dimension_numbers<[1], [0], [0], [1], [0, 0, 1, 1], [], []>} : vector<64x32xbf16>, vector<32x64xbf16>, vector<64x64xf32> -> vector<64x64xf32>
    %c0_10 = arith.constant 0 : index
    %c0_11 = arith.constant 0 : index
    %c0_12 = arith.constant 0 : index
    %9 = vector.load %arg5[%c0_10, %c0_11, %c0_12] : memref<3x1x64xf32, #tpu.memory_space<vmem>>, vector<1x1x64xf32>
    %10 = vector.shape_cast %9 : vector<1x1x64xf32> to vector<1x64xf32>
    %11 = vector.broadcast %10 : vector<1x64xf32> to vector<64x64xf32>
    %12 = arith.addf %8, %11 : vector<64x64xf32>
    %cst_13 = arith.constant 5.000000e-01 : f32
    %13 = vector.broadcast %cst_13 : f32 to vector<64x64xf32>
    %14 = arith.mulf %13, %12 : vector<64x64xf32>
    %cst_14 = arith.constant 4.471500e-02 : f32
    %15 = vector.broadcast %cst_14 : f32 to vector<64x64xf32>
    %16 = arith.mulf %15, %12 : vector<64x64xf32>
    %17 = arith.mulf %16, %12 : vector<64x64xf32>
    %18 = arith.mulf %17, %12 : vector<64x64xf32>
    %19 = arith.addf %12, %18 : vector<64x64xf32>
    %cst_15 = arith.constant 0.797884583 : f32
    %20 = vector.broadcast %cst_15 : f32 to vector<64x64xf32>
    %21 = arith.mulf %20, %19 : vector<64x64xf32>
    %22 = math.tanh %21 : vector<64x64xf32>
    %cst_16 = arith.constant 1.000000e+00 : f32
    %23 = vector.broadcast %cst_16 : f32 to vector<64x64xf32>
    %24 = arith.addf %23, %22 : vector<64x64xf32>
    %25 = arith.mulf %14, %24 : vector<64x64xf32>
    %26 = arith.truncf %25 : vector<64x64xf32> to vector<64x64xbf16>
    %c0_17 = arith.constant 0 : index
    %c0_18 = arith.constant 0 : index
    %c0_19 = arith.constant 0 : index
    %27 = vector.load %arg6[%c0_17, %c0_18, %c0_19] : memref<3x64x32xbf16, #tpu.memory_space<vmem>>, vector<1x64x32xbf16>
    %28 = vector.shape_cast %27 : vector<1x64x32xbf16> to vector<64x32xbf16>
    %cst_20 = arith.constant dense<0.000000e+00> : vector<64x32xf32>
    %29 = tpu.matmul %26, %28, %cst_20 {dimension_numbers = #tpu.dot_dimension_numbers<[1], [0], [0], [1], [0, 0, 1, 1], [], []>} : vector<64x64xbf16>, vector<64x32xbf16>, vector<64x32xf32> -> vector<64x32xf32>
    %c0_21 = arith.constant 0 : index
    %c0_22 = arith.constant 0 : index
    %c0_23 = arith.constant 0 : index
    %30 = vector.load %arg7[%c0_21, %c0_22, %c0_23] : memref<3x1x32xf32, #tpu.memory_space<vmem>>, vector<1x1x32xf32>
    %31 = vector.shape_cast %30 : vector<1x1x32xf32> to vector<1x32xf32>
    %32 = vector.broadcast %31 : vector<1x32xf32> to vector<64x32xf32>
    %33 = arith.addf %29, %32 : vector<64x32xf32>
    %34 = vector.extract_strided_slice %33 {offsets = [0, 0], sizes = [32, 32], strides = [1, 1]} : vector<64x32xf32> to vector<32x32xf32>
    %35 = vector.extract_strided_slice %33 {offsets = [32, 0], sizes = [32, 32], strides = [1, 1]} : vector<64x32xf32> to vector<32x32xf32>
    %36 = arith.addf %34, %35 : vector<32x32xf32>
    %cst_24 = arith.constant dense<0.000000e+00> : vector<64x32xf32>
    %37 = tpu.matmul %3, %36, %cst_24 {dimension_numbers = #tpu.dot_dimension_numbers<[1], [0], [0], [1], [0, 0, 1, 1], [], []>} : vector<64x32xf32>, vector<32x32xf32>, vector<64x32xf32> -> vector<64x32xf32>
    %38 = arith.truncf %37 : vector<64x32xf32> to vector<64x32xbf16>
    %c1 = arith.constant 1 : index
    %c0_25 = arith.constant 0 : index
    %c0_26 = arith.constant 0 : index
    %39 = vector.load %arg4[%c1, %c0_25, %c0_26] : memref<3x32x64xbf16, #tpu.memory_space<vmem>>, vector<1x32x64xbf16>
    %40 = vector.shape_cast %39 : vector<1x32x64xbf16> to vector<32x64xbf16>
    %cst_27 = arith.constant dense<0.000000e+00> : vector<64x64xf32>
    %41 = tpu.matmul %38, %40, %cst_27 {dimension_numbers = #tpu.dot_dimension_numbers<[1], [0], [0], [1], [0, 0, 1, 1], [], []>} : vector<64x32xbf16>, vector<32x64xbf16>, vector<64x64xf32> -> vector<64x64xf32>
    %c1_28 = arith.constant 1 : index
    %c0_29 = arith.constant 0 : index
    %c0_30 = arith.constant 0 : index
    %42 = vector.load %arg5[%c1_28, %c0_29, %c0_30] : memref<3x1x64xf32, #tpu.memory_space<vmem>>, vector<1x1x64xf32>
    %43 = vector.shape_cast %42 : vector<1x1x64xf32> to vector<1x64xf32>
    %44 = vector.broadcast %43 : vector<1x64xf32> to vector<64x64xf32>
    %45 = arith.addf %41, %44 : vector<64x64xf32>
    %cst_31 = arith.constant 5.000000e-01 : f32
    %46 = vector.broadcast %cst_31 : f32 to vector<64x64xf32>
    %47 = arith.mulf %46, %45 : vector<64x64xf32>
    %cst_32 = arith.constant 4.471500e-02 : f32
    %48 = vector.broadcast %cst_32 : f32 to vector<64x64xf32>
    %49 = arith.mulf %48, %45 : vector<64x64xf32>
    %50 = arith.mulf %49, %45 : vector<64x64xf32>
    %51 = arith.mulf %50, %45 : vector<64x64xf32>
    %52 = arith.addf %45, %51 : vector<64x64xf32>
    %cst_33 = arith.constant 0.797884583 : f32
    %53 = vector.broadcast %cst_33 : f32 to vector<64x64xf32>
    %54 = arith.mulf %53, %52 : vector<64x64xf32>
    %55 = math.tanh %54 : vector<64x64xf32>
    %cst_34 = arith.constant 1.000000e+00 : f32
    %56 = vector.broadcast %cst_34 : f32 to vector<64x64xf32>
    %57 = arith.addf %56, %55 : vector<64x64xf32>
    %58 = arith.mulf %47, %57 : vector<64x64xf32>
    %59 = arith.truncf %58 : vector<64x64xf32> to vector<64x64xbf16>
    %c1_35 = arith.constant 1 : index
    %c0_36 = arith.constant 0 : index
    %c0_37 = arith.constant 0 : index
    %60 = vector.load %arg6[%c1_35, %c0_36, %c0_37] : memref<3x64x32xbf16, #tpu.memory_space<vmem>>, vector<1x64x32xbf16>
    %61 = vector.shape_cast %60 : vector<1x64x32xbf16> to vector<64x32xbf16>
    %cst_38 = arith.constant dense<0.000000e+00> : vector<64x32xf32>
    %62 = tpu.matmul %59, %61, %cst_38 {dimension_numbers = #tpu.dot_dimension_numbers<[1], [0], [0], [1], [0, 0, 1, 1], [], []>} : vector<64x64xbf16>, vector<64x32xbf16>, vector<64x32xf32> -> vector<64x32xf32>
    %c1_39 = arith.constant 1 : index
    %c0_40 = arith.constant 0 : index
    %c0_41 = arith.constant 0 : index
    %63 = vector.load %arg7[%c1_39, %c0_40, %c0_41] : memref<3x1x32xf32, #tpu.memory_space<vmem>>, vector<1x1x32xf32>
    %64 = vector.shape_cast %63 : vector<1x1x32xf32> to vector<1x32xf32>
    %65 = vector.broadcast %64 : vector<1x32xf32> to vector<64x32xf32>
    %66 = arith.addf %62, %65 : vector<64x32xf32>
    %67 = vector.extract_strided_slice %66 {offsets = [0, 0], sizes = [32, 32], strides = [1, 1]} : vector<64x32xf32> to vector<32x32xf32>
    %68 = vector.extract_strided_slice %66 {offsets = [32, 0], sizes = [32, 32], strides = [1, 1]} : vector<64x32xf32> to vector<32x32xf32>
    %69 = arith.addf %67, %68 : vector<32x32xf32>
    %cst_42 = arith.constant dense<0.000000e+00> : vector<64x32xf32>
    %70 = tpu.matmul %3, %69, %cst_42 {dimension_numbers = #tpu.dot_dimension_numbers<[1], [0], [0], [1], [0, 0, 1, 1], [], []>} : vector<64x32xf32>, vector<32x32xf32>, vector<64x32xf32> -> vector<64x32xf32>
    %71 = arith.truncf %70 : vector<64x32xf32> to vector<64x32xbf16>
    %c2 = arith.constant 2 : index
    %c0_43 = arith.constant 0 : index
    %c0_44 = arith.constant 0 : index
    %72 = vector.load %arg4[%c2, %c0_43, %c0_44] : memref<3x32x64xbf16, #tpu.memory_space<vmem>>, vector<1x32x64xbf16>
    %73 = vector.shape_cast %72 : vector<1x32x64xbf16> to vector<32x64xbf16>
    %cst_45 = arith.constant dense<0.000000e+00> : vector<64x64xf32>
    %74 = tpu.matmul %71, %73, %cst_45 {dimension_numbers = #tpu.dot_dimension_numbers<[1], [0], [0], [1], [0, 0, 1, 1], [], []>} : vector<64x32xbf16>, vector<32x64xbf16>, vector<64x64xf32> -> vector<64x64xf32>
    %c2_46 = arith.constant 2 : index
    %c0_47 = arith.constant 0 : index
    %c0_48 = arith.constant 0 : index
    %75 = vector.load %arg5[%c2_46, %c0_47, %c0_48] : memref<3x1x64xf32, #tpu.memory_space<vmem>>, vector<1x1x64xf32>
    %76 = vector.shape_cast %75 : vector<1x1x64xf32> to vector<1x64xf32>
    %77 = vector.broadcast %76 : vector<1x64xf32> to vector<64x64xf32>
    %78 = arith.addf %74, %77 : vector<64x64xf32>
    %cst_49 = arith.constant 5.000000e-01 : f32
    %79 = vector.broadcast %cst_49 : f32 to vector<64x64xf32>
    %80 = arith.mulf %79, %78 : vector<64x64xf32>
    %cst_50 = arith.constant 4.471500e-02 : f32
    %81 = vector.broadcast %cst_50 : f32 to vector<64x64xf32>
    %82 = arith.mulf %81, %78 : vector<64x64xf32>
    %83 = arith.mulf %82, %78 : vector<64x64xf32>
    %84 = arith.mulf %83, %78 : vector<64x64xf32>
    %85 = arith.addf %78, %84 : vector<64x64xf32>
    %cst_51 = arith.constant 0.797884583 : f32
    %86 = vector.broadcast %cst_51 : f32 to vector<64x64xf32>
    %87 = arith.mulf %86, %85 : vector<64x64xf32>
    %88 = math.tanh %87 : vector<64x64xf32>
    %cst_52 = arith.constant 1.000000e+00 : f32
    %89 = vector.broadcast %cst_52 : f32 to vector<64x64xf32>
    %90 = arith.addf %89, %88 : vector<64x64xf32>
    %91 = arith.mulf %80, %90 : vector<64x64xf32>
    %92 = arith.truncf %91 : vector<64x64xf32> to vector<64x64xbf16>
    %c2_53 = arith.constant 2 : index
    %c0_54 = arith.constant 0 : index
    %c0_55 = arith.constant 0 : index
    %93 = vector.load %arg6[%c2_53, %c0_54, %c0_55] : memref<3x64x32xbf16, #tpu.memory_space<vmem>>, vector<1x64x32xbf16>
    %94 = vector.shape_cast %93 : vector<1x64x32xbf16> to vector<64x32xbf16>
    %cst_56 = arith.constant dense<0.000000e+00> : vector<64x32xf32>
    %95 = tpu.matmul %92, %94, %cst_56 {dimension_numbers = #tpu.dot_dimension_numbers<[1], [0], [0], [1], [0, 0, 1, 1], [], []>} : vector<64x64xbf16>, vector<64x32xbf16>, vector<64x32xf32> -> vector<64x32xf32>
    %c2_57 = arith.constant 2 : index
    %c0_58 = arith.constant 0 : index
    %c0_59 = arith.constant 0 : index
    %96 = vector.load %arg7[%c2_57, %c0_58, %c0_59] : memref<3x1x32xf32, #tpu.memory_space<vmem>>, vector<1x1x32xf32>
    %97 = vector.shape_cast %96 : vector<1x1x32xf32> to vector<1x32xf32>
    %98 = vector.broadcast %97 : vector<1x32xf32> to vector<64x32xf32>
    %99 = arith.addf %95, %98 : vector<64x32xf32>
    %100 = vector.extract_strided_slice %99 {offsets = [0, 0], sizes = [32, 32], strides = [1, 1]} : vector<64x32xf32> to vector<32x32xf32>
    %101 = vector.extract_strided_slice %99 {offsets = [32, 0], sizes = [32, 32], strides = [1, 1]} : vector<64x32xf32> to vector<32x32xf32>
    %102 = arith.addf %100, %101 : vector<32x32xf32>
    %cst_60 = arith.constant 5.000000e-01 : f32
    %103 = vector.broadcast %cst_60 : f32 to vector<32x32xf32>
    %104 = arith.mulf %103, %102 : vector<32x32xf32>
    %cst_61 = arith.constant 4.471500e-02 : f32
    %105 = vector.broadcast %cst_61 : f32 to vector<32x32xf32>
    %106 = arith.mulf %105, %102 : vector<32x32xf32>
    %107 = arith.mulf %106, %102 : vector<32x32xf32>
    %108 = arith.mulf %107, %102 : vector<32x32xf32>
    %109 = arith.addf %102, %108 : vector<32x32xf32>
    %cst_62 = arith.constant 0.797884583 : f32
    %110 = vector.broadcast %cst_62 : f32 to vector<32x32xf32>
    %111 = arith.mulf %110, %109 : vector<32x32xf32>
    %112 = math.tanh %111 : vector<32x32xf32>
    %cst_63 = arith.constant 1.000000e+00 : f32
    %113 = vector.broadcast %cst_63 : f32 to vector<32x32xf32>
    %114 = arith.addf %113, %112 : vector<32x32xf32>
    %115 = arith.mulf %104, %114 : vector<32x32xf32>
    %c0_64 = arith.constant 0 : index
    %c0_65 = arith.constant 0 : index
    %116 = vector.load %arg8[%c0_64, %c0_65] : memref<32x32xf32, #tpu.memory_space<vmem>>, vector<32x32xf32>
    tpu.vector_store %arg8[%c0_64, %c0_65], %115 {strides = array<i32>} : memref<32x32xf32, #tpu.memory_space<vmem>>, vector<32x32xf32>,
    return
  }
  func.func @transform_0(%arg0: i32) -> (i32, i32) {
    %c0_i32 = arith.constant 0 : i32
    %c0_i32_0 = arith.constant 0 : i32
    %c0_i32_1 = arith.constant 0 : i32
    return %c0_i32, %c0_i32_0 : i32, i32
  }
  func.func @transform_1(%arg0: i32) -> (i32, i32) {
    %c0_i32 = arith.constant 0 : i32
    %c0_i32_0 = arith.constant 0 : i32
    %c0_i32_1 = arith.constant 0 : i32
    return %c0_i32, %c0_i32_0 : i32, i32
  }
  func.func @transform_2(%arg0: i32) -> (i32, i32) {
    %c0_i32 = arith.constant 0 : i32
    %c0_i32_0 = arith.constant 0 : i32
    %c0_i32_1 = arith.constant 0 : i32
    return %c0_i32, %c0_i32_0 : i32, i32
  }
  func.func @transform_3(%arg0: i32) -> (i32, i32, i32) {
    %c0_i32 = arith.constant 0 : i32
    %c0_i32_0 = arith.constant 0 : i32
    %c0_i32_1 = arith.constant 0 : i32
    %c0_i32_2 = arith.constant 0 : i32
    return %c0_i32, %c0_i32_0, %c0_i32_1 : i32, i32, i32
  }
  func.func @transform_4(%arg0: i32) -> (i32, i32, i32) {
    %c0_i32 = arith.constant 0 : i32
    %c0_i32_0 = arith.constant 0 : i32
    %c0_i32_1 = arith.constant 0 : i32
    %c0_i32_2 = arith.constant 0 : i32
    return %c0_i32, %c0_i32_0, %c0_i32_1 : i32, i32, i32
  }
  func.func @transform_5(%arg0: i32) -> (i32, i32, i32) {
    %c0_i32 = arith.constant 0 : i32
    %c0_i32_0 = arith.constant 0 : i32
    %c0_i32_1 = arith.constant 0 : i32
    %c0_i32_2 = arith.constant 0 : i32
    return %c0_i32, %c0_i32_0, %c0_i32_1 : i32, i32, i32
  }
  func.func @transform_6(%arg0: i32) -> (i32, i32, i32) {
    %c0_i32 = arith.constant 0 : i32
    %c0_i32_0 = arith.constant 0 : i32
    %c0_i32_1 = arith.constant 0 : i32
    %c0_i32_2 = arith.constant 0 : i32
    return %c0_i32, %c0_i32_0, %c0_i32_1 : i32, i32, i32
  }
  func.func @transform_7(%arg0: i32) -> (i32, i32) {
    %c0_i32 = arith.constant 0 : i32
    %c0_i32_0 = arith.constant 0 : i32
    %c0_i32_1 = arith.constant 0 : i32
    return %c0_i32, %c0_i32_0 : i32, i32
  }
}

</mosaic_0001>

<bundles_post_ra>
// kernel: timemixer_forward.1
= control target key start
LH: loop header
LB: loop body
LE: loop exit
PB: predicated region body
PF: predicated region fallthrough
CT: control target
= control target key end

     0   :  { %vm55_vm0 = vcmask 1045504   ;;  %vm48_vm1 = vcmask 97280   ;;  %vm116_vm2 = vcmask 261120   ;;  %vm465_vm3 = vcmask 523264   ;;  %s2150_s2 = inlined_call_operand.vmem [shape: bf16[12,32], index: 2, kind: input, shape index: {}]   ;;  %s2151_s0 = inlined_call_operand.vmem [shape: bf16[32,12], index: 0, kind: input, shape index: {}]   ;;  %s2152_s1 = inlined_call_operand.vmem [shape: f32[64,32], index: 1, kind: input, shape index: {}]   ;;  %s2153_s3 = inlined_call_operand.vmem [shape: bf16[3,32,64], index: 3, kind: input, shape index: {}]   ;;  %s2154_s5 = inlined_call_operand.vmem [shape: bf16[3,64,32], index: 5, kind: input, shape index: {}]   ;;  %s2155_s4 = inlined_call_operand.vmem [shape: f32[3,1,64], index: 4, kind: input, shape index: {}]   ;;  %s2156_s6 = inlined_call_operand.vmem [shape: f32[3,1,32], index: 6, kind: input, shape index: {}]   ;;  %s2157_s7 = inlined_call_operand.vmem [shape: f32[32,32], index: 7, kind: output, shape index: {}]  }
   0x1   :  { %v1754_v0 = vld [vmem:[%s2150_s2] sm:$0x3f]   ;;  %v1756_v3 = vld [vmem:[%s2151_s0 + $0x8] sm:$0xff]   ;;  %v1895_v10 = vld [vmem:[%s2152_s1 + $0x10] sm:$0xff] }
   0x2   :  { %v1755_v1 = vld [vmem:[%s2151_s0] sm:$0xff]   ;;  %1753 = vmatprep.subr.msk.bf16.mxu0 %vm55_vm0, %v1754_v0  ;;  %v57_v2 = vsel %vm55_vm0, %v1754_v0, 0  ;;  %v1890_v9 = vld [vmem:[%s2152_s1 + $0x8] sm:$0xff]  ;;  %v1904_v11 = vld [vmem:[%s2152_s1 + $0x18] sm:$0xff] }
   0x3   :  { %1596 = vmatpush3.bf16.msra.mxu0 %v57_v2  ;;  %1597 = vmatprep.mubr.msk.bf16.mxu0 %vm48_vm1, %v1755_v1  ;;  %v1883_v4 = vld [vmem:[%s2152_s1] sm:$0xff]  ;;  %v1918_v13 = vld [vmem:[%s2152_s1 + $0x28] sm:$0xff]  ;;  %v1923_v14 = vld [vmem:[%s2152_s1 + $0x30] sm:$0xff] }
   0x4   :  { %1609 = vmatprep.mubr.msk.f32.mxu1 %vm116_vm2, %v1883_v4  ;;  %v1909_v12 = vld [vmem:[%s2152_s1 + $0x20] sm:$0xff]  ;;  %v1932_v15 = vld [vmem:[%s2152_s1 + $0x38] sm:$0xff]  ;;  %v1757_v16 = vld [vmem:[%s2153_s3 + $0x8] sm:$0xff]  }
   0x5   :  { %1621 = vmatprep.subr.bf16.mxu0 %v1757_v16  ;;  %v1758_v17 = vld [vmem:[%s2153_s3] sm:$0xff]   ;;  %v1759_v30 = vld [vmem:[%s2154_s5 + $0x18] sm:$0xff]   ;;  %v1760_v31 = vld [vmem:[%s2154_s5 + $0x10] sm:$0xff]  }
   0x6   :  { %1598 = vmatmul.mubr.msk.bf16.vlgmr.msra.gmra.mxu0 %vm48_vm1, %v1756_v3  ;;  %v1761_v32 = vld [vmem:[%s2154_s5 + $0x8] sm:$0xff]   ;;  %v1762_v33 = vld [vmem:[%s2154_s5] sm:$0xff]  }
   0x7   :  { %1622 = vmatpush3.bf16.msra.mxu0 %v1757_v16  ;;  %v1422_v34 = vld [vmem:[%s2155_s4] ss:$0 sm:$0xff] }
   0x8   :  { %1623 = vmatprep.subr.bf16.mxu0 %v1758_v17 }
   0xb   :  { %1624 = vmatpush3.bf16.msra.mxu0 %v1758_v17 }
   0xc   :  { %1633 = vmatprep.subr.bf16.mxu0 %v1759_v30 }
  0xc6   :  { %v1599_v5 = vpop.f32.mrf.mxu0 }
  0xc8   :  { %v93_v6 = vpop.f32.mrf.mxu0 }
  0xca   :  { %v1600_v7 = vpop.f32.mrf.mxu0 }
  0xcb   :  { %1601 = vmatprep.subr.mxu1 %v1600_v7 }
  0xcc   :  { %1602 = vmatpush3.msra.mxu1 %v1600_v7  ;;  %v96_v8 = vpop.f32.mrf.mxu0 }
  0xcd   :  { %1603 = vmatprep.subr.mxu1 %v1599_v5 }
  0xce   :  { %1604 = vmatpush3.msra.mxu1 %v1599_v5 }
  0xcf   :  { %1605 = vmatprep.subr.mxu1 %v96_v8 }
  0xd0   :  { %1606 = vmatpush3.msra.mxu1 %v96_v8 }
  0xd1   :  { %1607 = vmatprep.subr.mxu1 %v93_v6 }
  0xd2   :  { %1608 = vmatpush3.msra.mxu1 %v93_v6 }
  0xd3   :  { %1610 = vmatmul.mubr.msk.f32.vlgmr.msra.gmra.mxu1 %vm116_vm2, %v1890_v9  ;;  %1745 = vmatprep.subr.bf16.mxu1 %v1759_v30 }
  0xd4   :  { %1612 = vmatprep.mubr.msk.f32.mxu1 %vm116_vm2, %v1895_v10  ;;  %1749 = vmatpush3.bf16.msra.mxu1 %v1759_v30 }
  0xd5   :  { %1746 = vmatprep.subr.bf16.mxu1 %v1760_v31 }
  0xd7   :  { %1613 = vmatmul.mubr.msk.f32.gmra.mxu1 %vm116_vm2, %v1904_v11 }
  0xd8   :  { %1615 = vmatprep.mubr.msk.f32.mxu1 %vm116_vm2, %v1909_v12  ;;  %1750 = vmatpush3.bf16.msra.mxu1 %v1760_v31 }
  0xd9   :  { %1747 = vmatprep.subr.bf16.mxu1 %v1761_v32 }
  0xdb   :  { %1616 = vmatmul.mubr.msk.f32.gmra.mxu1 %vm116_vm2, %v1918_v13 }
  0xdc   :  { %1618 = vmatprep.mubr.msk.f32.mxu1 %vm116_vm2, %v1923_v14  ;;  %1751 = vmatpush3.bf16.msra.mxu1 %v1761_v32 }
  0xdd   :  { %1748 = vmatprep.subr.bf16.mxu1 %v1762_v33 }
  0xdf   :  { %1619 = vmatmul.mubr.msk.f32.gmra.mxu1 %vm116_vm2, %v1932_v15 }
  0xe0   :  { %1752 = vmatpush3.bf16.msra.mxu1 %v1762_v33 }
 0x193   :  { %v1611_v18 = vpop.f32.mrf.mxu1 }
 0x195   :  { %v207_v19 = vpop.f32.mrf.mxu1 }
 0x196   :  { %v246_v20 = vpack.c.bf16 %v1611_v18, %v207_v19 }
 0x197   :  { %v1614_v21 = vpop.f32.mrf.mxu1 }
 0x198   :  { %1625 = vmatprep.mubr.msk.bf16.mxu0 %vm116_vm2, %v246_v20 }
 0x199   :  { %v217_v22 = vpop.f32.mrf.mxu1 }
 0x19a   :  { %v247_v23 = vpack.c.bf16 %v1614_v21, %v217_v22 }
 0x19b   :  { %v1617_v24 = vpop.f32.mrf.mxu1 }
 0x19c   :  { %1626 = vmatmul.mubr.msk.bf16.vlgmr.msra.gmra.mxu0 %vm116_vm2, %v247_v23 }
 0x19d   :  { %v227_v25 = vpop.f32.mrf.mxu1  ;;  %1634 = vmatpush3.bf16.msra.mxu0 %v1759_v30 }
 0x19e   :  { %v248_v26 = vpack.c.bf16 %v1617_v24, %v227_v25  ;;  %1635 = vmatprep.subr.bf16.mxu0 %v1760_v31 }
 0x19f   :  { %v1620_v27 = vpop.f32.mrf.mxu1 }
 0x1a0   :  { %1629 = vmatprep.mubr.msk.bf16.mxu0 %vm116_vm2, %v248_v26 }
 0x1a1   :  { %v237_v28 = vpop.f32.mrf.mxu1  ;;  %1636 = vmatpush3.bf16.msra.mxu0 %v1760_v31 }
 0x1a2   :  { %v249_v29 = vpack.c.bf16 %v1620_v27, %v237_v28  ;;  %1637 = vmatprep.subr.bf16.mxu0 %v1761_v32 }
 0x1a4   :  { %1630 = vmatmul.mubr.msk.bf16.gmra.mxu0 %vm116_vm2, %v249_v29 }
 0x1a5   :  { %1638 = vmatpush3.bf16.msra.mxu0 %v1761_v32 }
 0x1a6   :  { %1639 = vmatprep.subr.bf16.mxu0 %v1762_v33 }
 0x1a9   :  { %1640 = vmatpush3.bf16.msra.mxu0 %v1762_v33 }
 0x25c   :  { %v1627_v35 = vpop.f32.mrf.mxu0 }
 0x25d   :  { %v1961_v36 = vadd.f32 %v1627_v35, %v1422_v34 }
 0x25e   :  { %v319_v37 = vpop.f32.mrf.mxu0 }
 0x25f   :  { %v360_v38 = vmul.f32 0.044715, %v1961_v36  ;;  %v1964_v39 = vadd.f32 %v1422_v34, %v319_v37 }
 0x260   :  { %v1628_v40 = vpop.f32.mrf.mxu0 }
 0x261   :  { %v368_v41 = vmul.f32 %v360_v38, %v1961_v36  ;;  %v358_v42 = vmul.f32 0.044715, %v1964_v39  ;;  %v331_v43 = vadd.f32 %v1628_v40, %v1422_v34 }
 0x262   :  { %v322_v44 = vpop.f32.mrf.mxu0 }
 0x263   :  { %v376_v45 = vmul.f32 %v368_v41, %v1961_v36  ;;  %v366_v46 = vmul.f32 %v358_v42, %v1964_v39  ;;  %v361_v47 = vmul.f32 0.044715, %v331_v43  ;;  %v323_v48 = vadd.f32 %v1422_v34, %v322_v44 }
 0x264   :  { %v1631_v49 = vpop.f32.mrf.mxu0 }
 0x265   :  { %v384_v50 = vadd.f32 %v376_v45, %v1961_v36  ;;  %v374_v51 = vmul.f32 %v366_v46, %v1964_v39  ;;  %v369_v52 = vmul.f32 %v361_v47, %v331_v43  ;;  %v1972_v53 = vadd.f32 %v1631_v49, %v1422_v34 }
 0x266   :  { %v359_v54 = vmul.f32 0.044715, %v323_v48  ;;  %v335_v55 = vpop.f32.mrf.mxu0  ;;  %v353_v45 = vmul.f32 0.5, %v331_v43  ;;  %v350_v46 = vmul.f32 0.5, %v1964_v39  ;;  %v351_v47 = vmul.f32 0.5, %v323_v48 }
 0x267   :  { %v392_v56 = vmul.f32 0.7978846, %v384_v50  ;;  %v382_v57 = vadd.f32 %v374_v51, %v1964_v39  ;;  %v377_v58 = vmul.f32 %v369_v52, %v331_v43  ;;  %v364_v60 = vmul.f32 0.044715, %v1972_v53 }
 0x268   :  { %v367_v59 = vmul.f32 %v359_v54, %v323_v48  ;;  %v1976_v61 = vadd.f32 %v1422_v34, %v335_v55  ;;  %v1632_v62 = vpop.f32.mrf.mxu0  ;;  %v352_v50 = vmul.f32 0.5, %v1961_v36 }
 0x269   :  { %v390_v63 = vmul.f32 0.7978846, %v382_v57  ;;  %v385_v0 = vadd.f32 %v377_v58, %v331_v43  ;;  %v347_v1 = vadd.f32 %v1632_v62, %v1422_v34  ;;  %1775 = vtanh.f32 %v392_v56 }
 0x26a   :  { %v375_v2 = vmul.f32 %v367_v59, %v323_v48  ;;  %v372_v3 = vmul.f32 %v364_v60, %v1972_v53  ;;  %v362_v5 = vmul.f32 0.044715, %v1976_v61  ;;  %v338_v6 = vpop.f32.mrf.mxu0  ;;  %v354_v36 = vmul.f32 0.5, %v1976_v61 }
 0x26b   :  { %1777 = vtanh.f32 %v390_v63  ;;  %v393_v7 = vmul.f32 0.7978846, %v385_v0  ;;  %v365_v8 = vmul.f32 0.044715, %v347_v1  ;;  %v339_v19 = vadd.f32 %v1422_v34, %v338_v6 }
 0x26c   :  { %v383_v16 = vadd.f32 %v375_v2, %v323_v48  ;;  %v380_v17 = vmul.f32 %v372_v3, %v1972_v53  ;;  %v370_v18 = vmul.f32 %v362_v5, %v1976_v61  ;;  %v357_v48 = vmul.f32 0.5, %v347_v1 }
 0x26d   :  { %1779 = vtanh.f32 %v393_v7  ;;  %v373_v20 = vmul.f32 %v365_v8, %v347_v1  ;;  %v363_v24 = vmul.f32 0.044715, %v339_v19  ;;  %v355_v0 = vmul.f32 0.5, %v339_v19 }
 0x26e   :  { %v391_v21 = vmul.f32 0.7978846, %v383_v16  ;;  %v388_v22 = vadd.f32 %v380_v17, %v1972_v53  ;;  %v378_v23 = vmul.f32 %v370_v18, %v1976_v61  ;;  %v356_v3 = vmul.f32 0.5, %v1972_v53 }
 0x26f   :  { %v381_v25 = vmul.f32 %v373_v20, %v347_v1  ;;  %v371_v28 = vmul.f32 %v363_v24, %v339_v19 }
 0x270   :  { %1781 = vtanh.f32 %v391_v21  ;;  %v396_v26 = vmul.f32 0.7978846, %v388_v22  ;;  %v386_v27 = vadd.f32 %v378_v23, %v1976_v61  ;;  %v1429_v21 = vld [vmem:[%s2156_s6] ss:$0 sm:$0xff] }
 0x271   :  { %v389_v29 = vadd.f32 %v381_v25, %v347_v1  ;;  %v379_v31 = vmul.f32 %v371_v28, %v339_v19 }
 0x272   :  { %v394_v30 = vmul.f32 0.7978846, %v386_v27  ;;  %1783 = vtanh.f32 %v396_v26 }
 0x273   :  { %v397_v32 = vmul.f32 0.7978846, %v389_v29  ;;  %v387_v33 = vadd.f32 %v379_v31, %v339_v19 }
 0x274   :  { %1785 = vtanh.f32 %v394_v30 }
 0x275   :  { %1787 = vtanh.f32 %v397_v32  ;;  %v395_v34 = vmul.f32 0.7978846, %v387_v33 }
 0x276   :  { %v1776_v35 = vpop.eup %1775 }
 0x277   :  { %1789 = vtanh.f32 %v395_v34  ;;  %v408_v44 = vadd.f32 1.0, %v1776_v35 }
 0x278   :  { %v1778_v37 = vpop.eup %1777 }
 0x279   :  { %v406_v41 = vadd.f32 1.0, %v1778_v37  ;;  %v416_v57 = vmul.f32 %v408_v44, %v352_v50  ;;  %v1763_v37 = vld [vmem:[%s2153_s3 + $0x18] sm:$0xff]  }
 0x27a   :  { %v1780_v38 = vpop.eup %1779  ;;  %1669 = vmatprep.subr.bf16.mxu1 %v1763_v37 }
 0x27b   :  { %v409_v40 = vadd.f32 1.0, %v1780_v38  ;;  %v414_v54 = vmul.f32 %v406_v41, %v350_v46  ;;  %v1764_v38 = vld [vmem:[%s2153_s3 + $0x10] sm:$0xff]  }
 0x27d   :  { %v1782_v42 = vpop.eup %1781  ;;  %v417_v51 = vmul.f32 %v409_v40, %v353_v45 }
 0x27e   :  { %v407_v49 = vadd.f32 1.0, %v1782_v42 }
 0x27f   :  { %v1784_v52 = vpop.eup %1783  ;;  %v423_v60 = vpack.c.bf16 %v417_v51, %v416_v57  ;;  %v1767_v57 = vld [vmem:[%s2154_s5 + $0x28] sm:$0xff]  }
 0x280   :  { %v415_v55 = vmul.f32 %v407_v49, %v351_v47  ;;  %v412_v39 = vadd.f32 1.0, %v1784_v52 }
 0x281   :  { %v1786_v56 = vpop.eup %1785 }
 0x282   :  { %v1788_v58 = vpop.eup %1787  ;;  %v422_v59 = vpack.c.bf16 %v415_v55, %v414_v54  ;;  %v410_v43 = vadd.f32 1.0, %v1786_v56  ;;  %v420_v8 = vmul.f32 %v412_v39, %v356_v3  ;;  %v1765_v55 = vld [vmem:[%s2154_s5 + $0x38] sm:$0xff]   ;;  %v1766_v56 = vld [vmem:[%s2154_s5 + $0x30] sm:$0xff]  }
 0x283   :  { %v413_v62 = vadd.f32 1.0, %v1788_v58  ;;  %v1451_v58 = vld [vmem:[%s2155_s4 + $0x1] ss:$0 sm:$0xff] }
 0x284   :  { %1641 = vmatprep.mubr.msk.bf16.mxu0 %vm465_vm3, %v422_v59  ;;  %v1790_v63 = vpop.eup %1789  ;;  %v418_v6 = vmul.f32 %v410_v43, %v354_v36 }
 0x285   :  { %1642 = vmatmul.mubr.msk.bf16.vlgmr.msra.gmra.mxu0 %vm465_vm3, %v423_v60  ;;  %v411_v2 = vadd.f32 1.0, %v1790_v63  ;;  %v421_v5 = vmul.f32 %v413_v62, %v357_v48 }
 0x286   :  { %1657 = vmatprep.mubr.msk.f32.mxu0 %vm116_vm2, %v1883_v4 }
 0x287   :  { %v419_v7 = vmul.f32 %v411_v2, %v355_v0  ;;  %v425_v17 = vpack.c.bf16 %v421_v5, %v420_v8 }
 0x289   :  { %v424_v16 = vpack.c.bf16 %v419_v7, %v418_v6 }
 0x28b   :  { %1645 = vmatprep.mubr.msk.bf16.mxu1 %vm465_vm3, %v424_v16 }
 0x28c   :  { %1646 = vmatmul.mubr.msk.bf16.vlgmr.msra.gmra.mxu1 %vm465_vm3, %v425_v17 }
 0x28d   :  { %1670 = vmatpush3.bf16.msra.mxu1 %v1763_v37 }
 0x28e   :  { %1671 = vmatprep.subr.bf16.mxu1 %v1764_v38 }
 0x291   :  { %1672 = vmatpush3.bf16.msra.mxu1 %v1764_v38 }
 0x345   :  { %v1643_v1 = vpop.f32.mrf.mxu0 }
 0x346   :  { %v521_v27 = vadd.f32 %v1643_v1, %v1429_v21 }
 0x347   :  { %v512_v18 = vpop.f32.mrf.mxu0 }
 0x348   :  { %v513_v33 = vadd.f32 %v1429_v21, %v512_v18 }
 0x349   :  { %v1644_v19 = vpop.f32.mrf.mxu0 }
 0x34a   :  { %v524_v22 = vadd.f32 %v1644_v19, %v1429_v21 }
 0x34b   :  { %v515_v25 = vpop.f32.mrf.mxu0 }
 0x34c   :  { %v1647_v61 = vpop.f32.mrf.mxu1  ;;  %v516_v30 = vadd.f32 %v1429_v21, %v515_v25 }
 0x34d   :  { %v537_v23 = vadd.f32 %v1647_v61, %v1429_v21 }
 0x34e   :  { %v528_v20 = vpop.f32.mrf.mxu1 }
 0x34f   :  { %v545_v31 = vadd.f32 %v537_v23, %v521_v27  ;;  %v529_v32 = vadd.f32 %v1429_v21, %v528_v20 }
 0x350   :  { %v1648_v53 = vpop.f32.mrf.mxu1 }
 0x351   :  { %v540_v24 = vadd.f32 %v1648_v53, %v1429_v21  ;;  %v543_v35 = vadd.f32 %v529_v32, %v513_v33 }
 0x352   :  { %v531_v26 = vpop.f32.mrf.mxu1 }
 0x353   :  { %v546_v28 = vadd.f32 %v540_v24, %v524_v22  ;;  %v532_v29 = vadd.f32 %v1429_v21, %v531_v26 }
 0x355   :  { %1649 = vmatprep.subr.mxu0 %v546_v28  ;;  %v544_v34 = vadd.f32 %v532_v29, %v516_v30 }
 0x356   :  { %1650 = vmatpush3.msra.mxu0 %v546_v28 }
 0x357   :  { %1651 = vmatprep.subr.mxu0 %v545_v31 }
 0x358   :  { %1652 = vmatpush3.msra.mxu0 %v545_v31 }
 0x359   :  { %1653 = vmatprep.subr.mxu0 %v544_v34 }
 0x35a   :  { %1654 = vmatpush3.msra.mxu0 %v544_v34 }
 0x35b   :  { %1655 = vmatprep.subr.mxu0 %v543_v35 }
 0x35c   :  { %1656 = vmatpush3.msra.mxu0 %v543_v35 }
 0x35d   :  { %1658 = vmatmul.mubr.msk.f32.vlgmr.msra.gmra.mxu0 %vm116_vm2, %v1890_v9  ;;  %1681 = vmatprep.subr.bf16.mxu0 %v1765_v55 }
 0x35e   :  { %1660 = vmatprep.mubr.msk.f32.mxu0 %vm116_vm2, %v1895_v10  ;;  %1682 = vmatpush3.bf16.msra.mxu0 %v1765_v55 }
 0x35f   :  { %1683 = vmatprep.subr.bf16.mxu0 %v1766_v56 }
 0x361   :  { %1661 = vmatmul.mubr.msk.f32.gmra.mxu0 %vm116_vm2, %v1904_v11 }
 0x362   :  { %1663 = vmatprep.mubr.msk.f32.mxu0 %vm116_vm2, %v1909_v12  ;;  %1684 = vmatpush3.bf16.msra.mxu0 %v1766_v56 }
 0x363   :  { %1685 = vmatprep.subr.bf16.mxu0 %v1767_v57 }
 0x365   :  { %1664 = vmatmul.mubr.msk.f32.gmra.mxu0 %vm116_vm2, %v1918_v13 }
 0x366   :  { %1666 = vmatprep.mubr.msk.f32.mxu0 %vm116_vm2, %v1923_v14  ;;  %1686 = vmatpush3.bf16.msra.mxu0 %v1767_v57 }
 0x369   :  { %1667 = vmatmul.mubr.msk.f32.gmra.mxu0 %vm116_vm2, %v1932_v15 }
 0x41d   :  { %v1659_v40 = vpop.f32.mrf.mxu0 }
 0x41f   :  { %v613_v41 = vpop.f32.mrf.mxu0 }
 0x420   :  { %v652_v42 = vpack.c.bf16 %v1659_v40, %v613_v41 }
 0x421   :  { %v1662_v44 = vpop.f32.mrf.mxu0 }
 0x422   :  { %1673 = vmatprep.mubr.msk.bf16.mxu1 %vm116_vm2, %v652_v42 }
 0x423   :  { %v623_v45 = vpop.f32.mrf.mxu0 }
 0x424   :  { %v653_v46 = vpack.c.bf16 %v1662_v44, %v623_v45 }
 0x425   :  { %v1665_v47 = vpop.f32.mrf.mxu0 }
 0x426   :  { %1674 = vmatmul.mubr.msk.bf16.vlgmr.msra.gmra.mxu1 %vm116_vm2, %v653_v46 }
 0x427   :  { %v633_v49 = vpop.f32.mrf.mxu0 }
 0x428   :  { %v654_v50 = vpack.c.bf16 %v1665_v47, %v633_v49 }
 0x429   :  { %v1668_v51 = vpop.f32.mrf.mxu0 }
 0x42a   :  { %1677 = vmatprep.mubr.msk.bf16.mxu1 %vm116_vm2, %v654_v50 }
 0x42b   :  { %v643_v52 = vpop.f32.mrf.mxu0 }
 0x42c   :  { %v655_v54 = vpack.c.bf16 %v1668_v51, %v643_v52 }
 0x42e   :  { %1678 = vmatmul.mubr.msk.bf16.gmra.mxu1 %vm116_vm2, %v655_v54 }
 0x42f   :  { %1705 = vmatprep.mubr.msk.f32.mxu1 %vm116_vm2, %v1883_v4  ;;  %v1768_v4 = vld [vmem:[%s2154_s5 + $0x20] sm:$0xff]  }
 0x430   :  { %1687 = vmatprep.subr.bf16.mxu0 %v1768_v4 }
 0x431   :  { %1688 = vmatpush3.bf16.msra.mxu0 %v1768_v4 }
 0x4e6   :  { %v1675_v59 = vpop.f32.mrf.mxu1 }
 0x4e7   :  { %v2039_v60 = vadd.f32 %v1675_v59, %v1451_v58 }
 0x4e8   :  { %v727_v62 = vpop.f32.mrf.mxu1 }
 0x4e9   :  { %v768_v43 = vmul.f32 0.044715, %v2039_v60  ;;  %v2042_v63 = vadd.f32 %v1451_v58, %v727_v62 }
 0x4ea   :  { %v1676_v39 = vpop.f32.mrf.mxu1 }
 0x4eb   :  { %v776_v48 = vmul.f32 %v768_v43, %v2039_v60  ;;  %v766_v36 = vmul.f32 0.044715, %v2042_v63  ;;  %v739_v0 = vadd.f32 %v1676_v39, %v1451_v58 }
 0x4ec   :  { %v730_v2 = vpop.f32.mrf.mxu1 }
 0x4ed   :  { %v784_v3 = vmul.f32 %v776_v48, %v2039_v60  ;;  %v774_v5 = vmul.f32 %v766_v36, %v2042_v63  ;;  %v769_v6 = vmul.f32 0.044715, %v739_v0  ;;  %v731_v7 = vadd.f32 %v1451_v58, %v730_v2 }
 0x4ee   :  { %v1679_v8 = vpop.f32.mrf.mxu1  ;;  %v761_v2 = vmul.f32 0.5, %v739_v0 }
 0x4ef   :  { %v792_v16 = vadd.f32 %v784_v3, %v2039_v60  ;;  %v782_v17 = vmul.f32 %v774_v5, %v2042_v63  ;;  %v777_v1 = vmul.f32 %v769_v6, %v739_v0  ;;  %v2050_v18 = vadd.f32 %v1679_v8, %v1451_v58 }
 0x4f0   :  { %v767_v61 = vmul.f32 0.044715, %v731_v7  ;;  %v743_v19 = vpop.f32.mrf.mxu1  ;;  %v758_v3 = vmul.f32 0.5, %v2042_v63  ;;  %v759_v5 = vmul.f32 0.5, %v731_v7  ;;  %v760_v8 = vmul.f32 0.5, %v2039_v60 }
 0x4f1   :  { %v800_v20 = vmul.f32 0.7978846, %v792_v16  ;;  %v790_v21 = vadd.f32 %v782_v17, %v2042_v63  ;;  %v785_v53 = vmul.f32 %v777_v1, %v739_v0  ;;  %v772_v22 = vmul.f32 0.044715, %v2050_v18 }
 0x4f2   :  { %v775_v23 = vmul.f32 %v767_v61, %v731_v7  ;;  %v744_v24 = vadd.f32 %v1451_v58, %v743_v19  ;;  %v1680_v25 = vpop.f32.mrf.mxu1 }
 0x4f3   :  { %v798_v26 = vmul.f32 0.7978846, %v790_v21  ;;  %v793_v27 = vadd.f32 %v785_v53, %v739_v0  ;;  %v780_v28 = vmul.f32 %v772_v22, %v2050_v18  ;;  %v755_v31 = vadd.f32 %v1680_v25, %v1451_v58 }
 0x4f4   :  { %v783_v29 = vmul.f32 %v775_v23, %v731_v7  ;;  %v770_v30 = vmul.f32 0.044715, %v744_v24  ;;  %v746_v32 = vpop.f32.mrf.mxu1  ;;  %1791 = vtanh.f32 %v800_v20  ;;  %v762_v0 = vmul.f32 0.5, %v744_v24 }
 0x4f5   :  { %v801_v33 = vmul.f32 0.7978846, %v793_v27  ;;  %v788_v34 = vmul.f32 %v780_v28, %v2050_v18  ;;  %v747_v35 = vadd.f32 %v1451_v58, %v746_v32  ;;  %1793 = vtanh.f32 %v798_v26 }
 0x4f6   :  { %v791_v37 = vadd.f32 %v783_v29, %v731_v7  ;;  %v778_v38 = vmul.f32 %v770_v30, %v744_v24  ;;  %v773_v40 = vmul.f32 0.044715, %v755_v31  ;;  %v765_v60 = vmul.f32 0.5, %v755_v31 }
 0x4f7   :  { %1795 = vtanh.f32 %v801_v33  ;;  %v796_v41 = vadd.f32 %v788_v34, %v2050_v18  ;;  %v771_v42 = vmul.f32 0.044715, %v747_v35  ;;  %v763_v63 = vmul.f32 0.5, %v747_v35 }
 0x4f8   :  { %v799_v44 = vmul.f32 0.7978846, %v791_v37  ;;  %v786_v45 = vmul.f32 %v778_v38, %v744_v24  ;;  %v781_v46 = vmul.f32 %v773_v40, %v755_v31  ;;  %v764_v30 = vmul.f32 0.5, %v2050_v18 }
 0x4f9   :  { %v779_v47 = vmul.f32 %v771_v42, %v747_v35  ;;  %v804_v51 = vmul.f32 0.7978846, %v796_v41 }
 0x4fa   :  { %1797 = vtanh.f32 %v799_v44  ;;  %v794_v49 = vadd.f32 %v786_v45, %v744_v24  ;;  %v789_v50 = vmul.f32 %v781_v46, %v755_v31 }
 0x4fb   :  { %v787_v52 = vmul.f32 %v779_v47, %v747_v35 }
 0x4fc   :  { %v802_v54 = vmul.f32 0.7978846, %v794_v49  ;;  %v797_v55 = vadd.f32 %v789_v50, %v755_v31  ;;  %v1467_v31 = vld [vmem:[%s2156_s6 + $0x1] ss:$0 sm:$0xff] }
 0x4fd   :  { %v795_v56 = vadd.f32 %v787_v52, %v747_v35 }
 0x4fe   :  { %1799 = vtanh.f32 %v802_v54  ;;  %v805_v57 = vmul.f32 0.7978846, %v797_v55 }
 0x4ff   :  { %1801 = vtanh.f32 %v804_v51  ;;  %v803_v4 = vmul.f32 0.7978846, %v795_v56 }
 0x500   :  { %1803 = vtanh.f32 %v805_v57 }
 0x501   :  { %1805 = vtanh.f32 %v803_v4  ;;  %v1792_v58 = vpop.eup %1791 }
 0x502   :  { %v1794_v59 = vpop.eup %1793  ;;  %v816_v36 = vadd.f32 1.0, %v1792_v58 }
 0x503   :  { %v814_v39 = vadd.f32 1.0, %v1794_v59 }
 0x504   :  { %v1796_v62 = vpop.eup %1795  ;;  %v824_v19 = vmul.f32 %v816_v36, %v760_v8  ;;  %v1489_v8 = vld [vmem:[%s2155_s4 + $0x2] ss:$0 sm:$0xff] }
 0x505   :  { %v817_v43 = vadd.f32 1.0, %v1796_v62  ;;  %v822_v17 = vmul.f32 %v814_v39, %v758_v3  ;;  %v1772_v3 = vld [vmem:[%s2154_s5 + $0x50] sm:$0xff]  }
 0x507   :  { %v1798_v48 = vpop.eup %1797  ;;  %v825_v16 = vmul.f32 %v817_v43, %v761_v2  ;;  %v1771_v2 = vld [vmem:[%s2154_s5 + $0x58] sm:$0xff]  }
 0x508   :  { %v815_v6 = vadd.f32 1.0, %v1798_v48 }
 0x509   :  { %v831_v22 = vpack.c.bf16 %v825_v16, %v824_v19 }
 0x50a   :  { %v823_v1 = vmul.f32 %v815_v6, %v759_v5  ;;  %v1773_v5 = vld [vmem:[%s2154_s5 + $0x48] sm:$0xff]   ;;  %v1774_v6 = vld [vmem:[%s2154_s5 + $0x40] sm:$0xff]  }
 0x50b   :  { %v1800_v61 = vpop.eup %1799 }
 0x50c   :  { %v1802_v20 = vpop.eup %1801  ;;  %v830_v21 = vpack.c.bf16 %v823_v1, %v822_v17  ;;  %v818_v23 = vadd.f32 1.0, %v1800_v61 }
 0x50d   :  { %v1804_v53 = vpop.eup %1803  ;;  %v820_v27 = vadd.f32 1.0, %v1802_v20 }
 0x50e   :  { %v1806_v25 = vpop.eup %1805  ;;  %1689 = vmatprep.mubr.msk.bf16.mxu0 %vm465_vm3, %v830_v21  ;;  %v821_v26 = vadd.f32 1.0, %v1804_v53  ;;  %v826_v28 = vmul.f32 %v818_v23, %v762_v0 }
 0x50f   :  { %1690 = vmatmul.mubr.msk.bf16.vlgmr.msra.gmra.mxu0 %vm465_vm3, %v831_v22  ;;  %v819_v7 = vadd.f32 1.0, %v1806_v25  ;;  %v828_v34 = vmul.f32 %v820_v27, %v764_v30 }
 0x510   :  { %v829_v32 = vmul.f32 %v821_v26, %v765_v60 }
 0x511   :  { %v827_v29 = vmul.f32 %v819_v7, %v763_v63 }
 0x512   :  { %v833_v37 = vpack.c.bf16 %v829_v32, %v828_v34 }
 0x513   :  { %v832_v33 = vpack.c.bf16 %v827_v29, %v826_v28 }
 0x515   :  { %1693 = vmatprep.mubr.msk.bf16.mxu0 %vm465_vm3, %v832_v33 }
 0x517   :  { %1694 = vmatmul.mubr.msk.bf16.gmra.mxu0 %vm465_vm3, %v833_v37 }
 0x5cf   :  { %v1691_v24 = vpop.f32.mrf.mxu0 }
 0x5d0   :  { %v930_v49 = vadd.f32 %v1691_v24, %v1467_v31 }
 0x5d1   :  { %v921_v38 = vpop.f32.mrf.mxu0 }
 0x5d2   :  { %v922_v56 = vadd.f32 %v1467_v31, %v921_v38 }
 0x5d3   :  { %v1692_v40 = vpop.f32.mrf.mxu0 }
 0x5d4   :  { %v933_v18 = vadd.f32 %v1692_v40, %v1467_v31 }
 0x5d5   :  { %v924_v41 = vpop.f32.mrf.mxu0 }
 0x5d6   :  { %v925_v52 = vadd.f32 %v1467_v31, %v924_v41 }
 0x5d7   :  { %v1695_v35 = vpop.f32.mrf.mxu0 }
 0x5d8   :  { %v946_v45 = vadd.f32 %v1695_v35, %v1467_v31 }
 0x5d9   :  { %v937_v42 = vpop.f32.mrf.mxu0 }
 0x5da   :  { %v954_v54 = vadd.f32 %v946_v45, %v930_v49  ;;  %v938_v55 = vadd.f32 %v1467_v31, %v937_v42 }
 0x5db   :  { %v1696_v44 = vpop.f32.mrf.mxu0 }
 0x5dc   :  { %v949_v46 = vadd.f32 %v1696_v44, %v1467_v31  ;;  %v952_v4 = vadd.f32 %v938_v55, %v922_v56 }
 0x5dd   :  { %v940_v47 = vpop.f32.mrf.mxu0 }
 0x5de   :  { %v955_v50 = vadd.f32 %v949_v46, %v933_v18  ;;  %v941_v51 = vadd.f32 %v1467_v31, %v940_v47 }
 0x5e0   :  { %1697 = vmatprep.subr.mxu1 %v955_v50  ;;  %v953_v57 = vadd.f32 %v941_v51, %v925_v52 }
 0x5e1   :  { %1698 = vmatpush3.msra.mxu1 %v955_v50 }
 0x5e2   :  { %1699 = vmatprep.subr.mxu1 %v954_v54 }
 0x5e3   :  { %1700 = vmatpush3.msra.mxu1 %v954_v54 }
 0x5e4   :  { %1701 = vmatprep.subr.mxu1 %v953_v57 }
 0x5e5   :  { %1702 = vmatpush3.msra.mxu1 %v953_v57 }
 0x5e6   :  { %1703 = vmatprep.subr.mxu1 %v952_v4 }
 0x5e7   :  { %1704 = vmatpush3.msra.mxu1 %v952_v4 }
 0x5e8   :  { %1706 = vmatmul.mubr.msk.f32.vlgmr.msra.gmra.mxu1 %vm116_vm2, %v1890_v9  ;;  %v1769_v9 = vld [vmem:[%s2153_s3 + $0x28] sm:$0xff]   ;;  %1729 = vmatprep.subr.bf16.mxu1 %v1771_v2 }
 0x5e9   :  { %1708 = vmatprep.mubr.msk.f32.mxu1 %vm116_vm2, %v1895_v10  ;;  %1717 = vmatprep.subr.bf16.mxu0 %v1769_v9  ;;  %v1770_v10 = vld [vmem:[%s2153_s3 + $0x20] sm:$0xff]  }
 0x5ea   :  { %1718 = vmatpush3.bf16.msra.mxu0 %v1769_v9  ;;  %1730 = vmatpush3.bf16.msra.mxu1 %v1771_v2 }
 0x5eb   :  { %1719 = vmatprep.subr.bf16.mxu0 %v1770_v10  ;;  %1731 = vmatprep.subr.bf16.mxu1 %v1772_v3 }
 0x5ec   :  { %1709 = vmatmul.mubr.msk.f32.gmra.mxu1 %vm116_vm2, %v1904_v11 }
 0x5ed   :  { %1711 = vmatprep.mubr.msk.f32.mxu1 %vm116_vm2, %v1909_v12 }
 0x5ee   :  { %1720 = vmatpush3.bf16.msra.mxu0 %v1770_v10  ;;  %1732 = vmatpush3.bf16.msra.mxu1 %v1772_v3 }
 0x5ef   :  { %1733 = vmatprep.subr.bf16.mxu1 %v1773_v5 }
 0x5f0   :  { %1712 = vmatmul.mubr.msk.f32.gmra.mxu1 %vm116_vm2, %v1918_v13 }
 0x5f1   :  { %1714 = vmatprep.mubr.msk.f32.mxu1 %vm116_vm2, %v1923_v14 }
 0x5f2   :  { %1734 = vmatpush3.bf16.msra.mxu1 %v1773_v5 }
 0x5f3   :  { %1735 = vmatprep.subr.bf16.mxu1 %v1774_v6 }
 0x5f4   :  { %1715 = vmatmul.mubr.msk.f32.gmra.mxu1 %vm116_vm2, %v1932_v15 }
 0x5f6   :  { %1736 = vmatpush3.bf16.msra.mxu1 %v1774_v6 }
 0x6a8   :  { %v1707_v11 = vpop.f32.mrf.mxu1 }
 0x6aa   :  { %v1022_v12 = vpop.f32.mrf.mxu1 }
 0x6ab   :  { %v1061_v13 = vpack.c.bf16 %v1707_v11, %v1022_v12 }
 0x6ac   :  { %v1710_v58 = vpop.f32.mrf.mxu1 }
 0x6ad   :  { %1721 = vmatprep.mubr.msk.bf16.mxu0 %vm116_vm2, %v1061_v13 }
 0x6ae   :  { %v1032_v14 = vpop.f32.mrf.mxu1 }
 0x6af   :  { %v1062_v15 = vpack.c.bf16 %v1710_v58, %v1032_v14 }
 0x6b0   :  { %v1713_v59 = vpop.f32.mrf.mxu1 }
 0x6b1   :  { %1722 = vmatmul.mubr.msk.bf16.vlgmr.msra.gmra.mxu0 %vm116_vm2, %v1062_v15 }
 0x6b2   :  { %v1042_v62 = vpop.f32.mrf.mxu1 }
 0x6b3   :  { %v1063_v43 = vpack.c.bf16 %v1713_v59, %v1042_v62 }
 0x6b4   :  { %v1716_v39 = vpop.f32.mrf.mxu1 }
 0x6b5   :  { %1725 = vmatprep.mubr.msk.bf16.mxu0 %vm116_vm2, %v1063_v43 }
 0x6b6   :  { %v1052_v48 = vpop.f32.mrf.mxu1 }
 0x6b7   :  { %v1064_v36 = vpack.c.bf16 %v1716_v39, %v1052_v48 }
 0x6b9   :  { %1726 = vmatmul.mubr.msk.bf16.gmra.mxu0 %vm116_vm2, %v1064_v36 }
 0x771   :  { %v1723_v16 = vpop.f32.mrf.mxu0 }
 0x772   :  { %v2106_v17 = vadd.f32 %v1723_v16, %v1489_v8 }
 0x773   :  { %v1136_v1 = vpop.f32.mrf.mxu0 }
 0x774   :  { %v1177_v61 = vmul.f32 0.044715, %v2106_v17  ;;  %v2109_v19 = vadd.f32 %v1489_v8, %v1136_v1 }
 0x775   :  { %v1724_v20 = vpop.f32.mrf.mxu0 }
 0x776   :  { %v1185_v21 = vmul.f32 %v1177_v61, %v2106_v17  ;;  %v1175_v53 = vmul.f32 0.044715, %v2109_v19  ;;  %v1148_v22 = vadd.f32 %v1724_v20, %v1489_v8  ;;  %v1167_v16 = vmul.f32 0.5, %v2109_v19 }
 0x777   :  { %v1139_v23 = vpop.f32.mrf.mxu0  ;;  %v1169_v20 = vmul.f32 0.5, %v2106_v17 }
 0x778   :  { %v1193_v25 = vmul.f32 %v1185_v21, %v2106_v17  ;;  %v1183_v0 = vmul.f32 %v1175_v53, %v2109_v19  ;;  %v1178_v26 = vmul.f32 0.044715, %v1148_v22  ;;  %v1140_v63 = vadd.f32 %v1489_v8, %v1139_v23 }
 0x779   :  { %v1727_v7 = vpop.f32.mrf.mxu0 }
 0x77a   :  { %v1201_v60 = vadd.f32 %v1193_v25, %v2106_v17  ;;  %v1191_v27 = vmul.f32 %v1183_v0, %v2109_v19  ;;  %v1186_v28 = vmul.f32 %v1178_v26, %v1148_v22  ;;  %v2117_v29 = vadd.f32 %v1727_v7, %v1489_v8 }
 0x77b   :  { %v1176_v30 = vmul.f32 0.044715, %v1140_v63  ;;  %v1152_v32 = vpop.f32.mrf.mxu0  ;;  %v1168_v1 = vmul.f32 0.5, %v1140_v63 }
 0x77c   :  { %v1209_v33 = vmul.f32 0.7978846, %v1201_v60  ;;  %v1199_v34 = vadd.f32 %v1191_v27, %v2109_v19  ;;  %v1194_v37 = vmul.f32 %v1186_v28, %v1148_v22  ;;  %v1181_v24 = vmul.f32 0.044715, %v2117_v29 }
 0x77d   :  { %v1184_v38 = vmul.f32 %v1176_v30, %v1140_v63  ;;  %v1153_v40 = vadd.f32 %v1489_v8, %v1152_v32  ;;  %v1728_v41 = vpop.f32.mrf.mxu0 }
 0x77e   :  { %v1207_v35 = vmul.f32 0.7978846, %v1199_v34  ;;  %v1202_v42 = vadd.f32 %v1194_v37, %v1148_v22  ;;  %v1189_v31 = vmul.f32 %v1181_v24, %v2117_v29  ;;  %v1164_v45 = vadd.f32 %v1728_v41, %v1489_v8 }
 0x77f   :  { %v1192_v44 = vmul.f32 %v1184_v38, %v1140_v63  ;;  %v1179_v18 = vmul.f32 0.044715, %v1153_v40  ;;  %v1155_v46 = vpop.f32.mrf.mxu0  ;;  %1807 = vtanh.f32 %v1209_v33  ;;  %v1173_v24 = vmul.f32 0.5, %v2117_v29 }
 0x780   :  { %v1210_v47 = vmul.f32 0.7978846, %v1202_v42  ;;  %v1197_v49 = vmul.f32 %v1189_v31, %v2117_v29  ;;  %v1156_v50 = vadd.f32 %v1489_v8, %v1155_v46  ;;  %1809 = vtanh.f32 %v1207_v35 }
 0x781   :  { %v1200_v51 = vadd.f32 %v1192_v44, %v1140_v63  ;;  %v1187_v52 = vmul.f32 %v1179_v18, %v1153_v40  ;;  %v1182_v54 = vmul.f32 0.044715, %v1164_v45  ;;  %v1170_v8 = vmul.f32 0.5, %v1148_v22  ;;  %v1505_v18 = vld [vmem:[%s2156_s6 + $0x2] ss:$0 sm:$0xff] }
 0x782   :  { %1811 = vtanh.f32 %v1210_v47  ;;  %v1205_v55 = vadd.f32 %v1197_v49, %v2117_v29  ;;  %v1180_v56 = vmul.f32 0.044715, %v1156_v50  ;;  %v1171_v22 = vmul.f32 0.5, %v1153_v40 }
 0x783   :  { %v1208_v57 = vmul.f32 0.7978846, %v1200_v51  ;;  %v1195_v4 = vmul.f32 %v1187_v52, %v1153_v40  ;;  %v1190_v9 = vmul.f32 %v1182_v54, %v1164_v45  ;;  %v1172_v19 = vmul.f32 0.5, %v1156_v50 }
 0x784   :  { %v1188_v10 = vmul.f32 %v1180_v56, %v1156_v50  ;;  %v1213_v13 = vmul.f32 0.7978846, %v1205_v55  ;;  %v1174_v17 = vmul.f32 0.5, %v1164_v45 }
 0x785   :  { %1813 = vtanh.f32 %v1208_v57  ;;  %v1203_v11 = vadd.f32 %v1195_v4, %v1153_v40  ;;  %v1198_v12 = vmul.f32 %v1190_v9, %v1164_v45 }
 0x786   :  { %v1196_v58 = vmul.f32 %v1188_v10, %v1156_v50 }
 0x787   :  { %v1211_v14 = vmul.f32 0.7978846, %v1203_v11  ;;  %v1206_v15 = vadd.f32 %v1198_v12, %v1164_v45 }
 0x788   :  { %v1204_v59 = vadd.f32 %v1196_v58, %v1156_v50 }
 0x789   :  { %1815 = vtanh.f32 %v1211_v14  ;;  %v1214_v62 = vmul.f32 0.7978846, %v1206_v15 }
 0x78a   :  { %1817 = vtanh.f32 %v1213_v13  ;;  %v1212_v43 = vmul.f32 0.7978846, %v1204_v59 }
 0x78b   :  { %1819 = vtanh.f32 %v1214_v62 }
 0x78c   :  { %1821 = vtanh.f32 %v1212_v43  ;;  %v1808_v39 = vpop.eup %1807 }
 0x78d   :  { %v1810_v48 = vpop.eup %1809  ;;  %v1225_v6 = vadd.f32 1.0, %v1808_v39 }
 0x78e   :  { %v1223_v3 = vadd.f32 1.0, %v1810_v48 }
 0x78f   :  { %v1812_v36 = vpop.eup %1811  ;;  %v1233_v0 = vmul.f32 %v1225_v6, %v1169_v20 }
 0x790   :  { %v1226_v2 = vadd.f32 1.0, %v1812_v36  ;;  %v1231_v53 = vmul.f32 %v1223_v3, %v1167_v16 }
 0x792   :  { %v1814_v5 = vpop.eup %1813  ;;  %v1234_v21 = vmul.f32 %v1226_v2, %v1170_v8 }
 0x793   :  { %v1224_v61 = vadd.f32 1.0, %v1814_v5 }
 0x794   :  { %v1240_v27 = vpack.c.bf16 %v1234_v21, %v1233_v0 }
 0x795   :  { %v1232_v23 = vmul.f32 %v1224_v61, %v1168_v1 }
 0x796   :  { %v1816_v25 = vpop.eup %1815 }
 0x797   :  { %v1818_v26 = vpop.eup %1817  ;;  %v1239_v7 = vpack.c.bf16 %v1232_v23, %v1231_v53  ;;  %v1227_v28 = vadd.f32 1.0, %v1816_v25 }
 0x798   :  { %v1820_v60 = vpop.eup %1819  ;;  %v1229_v33 = vadd.f32 1.0, %v1818_v26 }
 0x799   :  { %v1822_v30 = vpop.eup %1821  ;;  %1737 = vmatprep.mubr.msk.bf16.mxu1 %vm465_vm3, %v1239_v7  ;;  %v1230_v32 = vadd.f32 1.0, %v1820_v60  ;;  %v1235_v34 = vmul.f32 %v1227_v28, %v1171_v22 }
 0x79a   :  { %1738 = vmatmul.mubr.msk.bf16.vlgmr.msra.gmra.mxu1 %vm465_vm3, %v1240_v27  ;;  %v1228_v63 = vadd.f32 1.0, %v1822_v30  ;;  %v1237_v35 = vmul.f32 %v1229_v33, %v1173_v24 }
 0x79b   :  { %v1238_v38 = vmul.f32 %v1230_v32, %v1174_v17 }
 0x79c   :  { %v1236_v37 = vmul.f32 %v1228_v63, %v1172_v19 }
 0x79d   :  { %v1242_v42 = vpack.c.bf16 %v1238_v38, %v1237_v35 }
 0x79e   :  { %v1241_v41 = vpack.c.bf16 %v1236_v37, %v1235_v34 }
 0x7a0   :  { %1741 = vmatprep.mubr.msk.bf16.mxu1 %vm465_vm3, %v1241_v41 }
 0x7a2   :  { %1742 = vmatmul.mubr.msk.bf16.gmra.mxu1 %vm465_vm3, %v1242_v42 }
 0x85a   :  { %v1739_v40 = vpop.f32.mrf.mxu1 }
 0x85b   :  { %v1339_v47 = vadd.f32 %v1739_v40, %v1505_v18 }
 0x85c   :  { %v1330_v31 = vpop.f32.mrf.mxu1 }
 0x85d   :  { %v1331_v50 = vadd.f32 %v1505_v18, %v1330_v31 }
 0x85e   :  { %v1740_v44 = vpop.f32.mrf.mxu1 }
 0x85f   :  { %v1342_v55 = vadd.f32 %v1740_v44, %v1505_v18 }
 0x860   :  { %v1333_v45 = vpop.f32.mrf.mxu1 }
 0x861   :  { %v1334_v13 = vadd.f32 %v1505_v18, %v1333_v45 }
 0x862   :  { %v1743_v46 = vpop.f32.mrf.mxu1 }
 0x863   :  { %v1355_v49 = vadd.f32 %v1743_v46, %v1505_v18 }
 0x864   :  { %v1346_v29 = vpop.f32.mrf.mxu1 }
 0x865   :  { %v1363_v51 = vadd.f32 %v1355_v49, %v1339_v47  ;;  %v1347_v52 = vadd.f32 %v1505_v18, %v1346_v29 }
 0x866   :  { %v1744_v54 = vpop.f32.mrf.mxu1 }
 0x867   :  { %v1371_v56 = vmul.f32 0.044715, %v1363_v51  ;;  %v1361_v57 = vadd.f32 %v1347_v52, %v1331_v50  ;;  %v1358_v4 = vadd.f32 %v1744_v54, %v1505_v18  ;;  %v1367_v23 = vmul.f32 0.5, %v1363_v51 }
 0x868   :  { %v1349_v9 = vpop.f32.mrf.mxu1 }
 0x869   :  { %v1375_v10 = vmul.f32 %v1371_v56, %v1363_v51  ;;  %v1369_v11 = vmul.f32 0.044715, %v1361_v57  ;;  %v1364_v12 = vadd.f32 %v1358_v4, %v1342_v55  ;;  %v1350_v58 = vadd.f32 %v1505_v18, %v1349_v9 }
 0x86a   :  { %v1365_v7 = vmul.f32 0.5, %v1361_v57 }
 0x86b   :  { %v1379_v14 = vmul.f32 %v1375_v10, %v1363_v51  ;;  %v1373_v15 = vmul.f32 %v1369_v11, %v1361_v57  ;;  %v1372_v59 = vmul.f32 0.044715, %v1364_v12  ;;  %v1362_v62 = vadd.f32 %v1350_v58, %v1334_v13 }
 0x86c   :  { %v1368_v30 = vmul.f32 0.5, %v1364_v12 }
 0x86d   :  { %v1383_v43 = vadd.f32 %v1379_v14, %v1363_v51  ;;  %v1377_v39 = vmul.f32 %v1373_v15, %v1361_v57  ;;  %v1376_v48 = vmul.f32 %v1372_v59, %v1364_v12  ;;  %v1370_v36 = vmul.f32 0.044715, %v1362_v62 }
 0x86e   :  { %v1366_v63 = vmul.f32 0.5, %v1362_v62 }
 0x86f   :  { %v1387_v2 = vmul.f32 0.7978846, %v1383_v43  ;;  %v1381_v3 = vadd.f32 %v1377_v39, %v1361_v57  ;;  %v1380_v5 = vmul.f32 %v1376_v48, %v1364_v12  ;;  %v1374_v6 = vmul.f32 %v1370_v36, %v1362_v62 }
 0x871   :  { %1823 = vtanh.f32 %v1387_v2  ;;  %v1385_v8 = vmul.f32 0.7978846, %v1381_v3  ;;  %v1384_v16 = vadd.f32 %v1380_v5, %v1364_v12  ;;  %v1378_v1 = vmul.f32 %v1374_v6, %v1362_v62 }
 0x873   :  { %1825 = vtanh.f32 %v1385_v8  ;;  %v1388_v61 = vmul.f32 0.7978846, %v1384_v16  ;;  %v1382_v20 = vadd.f32 %v1378_v1, %v1362_v62 }
 0x875   :  { %1827 = vtanh.f32 %v1388_v61  ;;  %v1386_v21 = vmul.f32 0.7978846, %v1382_v20 }
 0x877   :  { %1829 = vtanh.f32 %v1386_v21 }
 0x87e   :  { %v1824_v53 = vpop.eup %1823 }
 0x87f   :  { %v1395_v25 = vadd.f32 1.0, %v1824_v53 }
 0x880   :  { %v1826_v0 = vpop.eup %1825 }
 0x881   :  { %v1399_v26 = vmul.f32 %v1395_v25, %v1367_v23  ;;  %v1393_v60 = vadd.f32 1.0, %v1826_v0 }
 0x882   :  { %v1828_v27 = vpop.eup %1827 }
 0x883   :  { %1403 = vst.msk [vmem:[%s2157_s7 + $0x10] sm:$0xff] %vm116_vm2, %v1399_v26  ;;  %v1397_v28 = vmul.f32 %v1393_v60, %v1365_v7  ;;  %v1396_v22 = vadd.f32 1.0, %v1828_v27 }
 0x884   :  { %v1830_v32 = vpop.eup %1829 }
 0x885   :  { %1401 = vst.msk [vmem:[%s2157_s7] sm:$0xff] %vm116_vm2, %v1397_v28  ;;  %v1400_v19 = vmul.f32 %v1396_v22, %v1368_v30  ;;  %v1394_v17 = vadd.f32 1.0, %v1830_v32 }
 0x887   :  { %1404 = vst.msk [vmem:[%s2157_s7 + $0x18] sm:$0xff] %vm116_vm2, %v1400_v19  ;;  %v1398_v33 = vmul.f32 %v1394_v17, %v1366_v63 }
 0x889   :  { %1402 = vst.msk [vmem:[%s2157_s7 + $0x8] sm:$0xff] %vm116_vm2, %v1398_v33 }

</bundles_post_ra>
